<compile_context>
chip_gen: v6e
topology: v6e:2x2x1
jax: 0.10.0
libtpu: 0.0.40
codegen_flags: <defaults>
</compile_context>

<pallas_src>
import functools

import jax
import jax.numpy as jnp
from jax import lax
from jax.experimental import pallas as pl
from jax.experimental.pallas import tpu as pltpu


def _vmem_limit_bytes():
    """Generation-aware scoped-VMEM budget: ~75% of physical, capped at 100 MiB.

    v5e/v6e (128 MiB physical) -> ~96 MiB; v7x (64 MiB physical) -> 48 MiB.
    """
    try:
        cap = pltpu.get_tpu_info().vmem_capacity_bytes
    except Exception:
        cap = 64 * 1024 * 1024  # conservative (v7x-sized) fallback
    return min(int(cap * 3 // 4), 100 * 1024 * 1024)


_VMEM_LIMIT = _vmem_limit_bytes()


# ----------------------------------------------------------------------------
# Pallas kernels
# ----------------------------------------------------------------------------

def _mm_bn_kernel(x_ref, w_ref, s_ref, b_ref, o_ref, *, relu):
    """(tile_p, K) x (K, Cout) matmul fused with folded-BN affine (+ ReLU).

    bf16 MXU operands, f32 accumulation and affine; output cast to o_ref.dtype.
    """
    acc = jnp.dot(x_ref[...].astype(jnp.bfloat16), w_ref[...],
                  preferred_element_type=jnp.float32)
    y = acc * s_ref[...] + b_ref[...]
    if relu:
        y = jnp.maximum(y, 0.0)
    o_ref[...] = y.astype(o_ref.dtype)


def matmul_bn(x, w_bf16, scale, shift, *, relu, out_dtype=jnp.bfloat16,
              tile_p=2048):
    """1x1 conv == matmul over the flattened (N*H*W) row dim, tiled over rows."""
    P, K = x.shape
    cout = w_bf16.shape[1]
    tp = min(tile_p, P)
    out_bytes = jnp.dtype(out_dtype).itemsize
    cost = pl.CostEstimate(
        flops=2 * P * K * cout,
        transcendentals=0,
        bytes_accessed=P * K * x.dtype.itemsize + K * cout * 2
        + P * cout * out_bytes)
    return pl.pallas_call(
        functools.partial(_mm_bn_kernel, relu=relu),
        grid=(pl.cdiv(P, tp),),
        in_specs=[
            pl.BlockSpec((tp, K), lambda i: (i, 0)),      # streamed activations
            pl.BlockSpec((K, cout), lambda i: (0, 0)),    # resident weight
            pl.BlockSpec((1, cout), lambda i: (0, 0)),    # resident BN scale
            pl.BlockSpec((1, cout), lambda i: (0, 0)),    # resident BN shift
        ],
        out_specs=pl.BlockSpec((tp, cout), lambda i: (i, 0)),
        out_shape=jax.ShapeDtypeStruct((P, cout), out_dtype),
        compiler_params=pltpu.CompilerParams(
            dimension_semantics=("parallel",),
            vmem_limit_bytes=_VMEM_LIMIT),
        cost_estimate=cost,
    )(x, w_bf16, scale.reshape(1, -1), shift.reshape(1, -1))


def _gconv_bn_relu_kernel(x_ref, w_ref, s_ref, b_ref, o_ref, pad_ref,
                          *, tile_h, w_out):
    """3x3 grouped conv (stride-1) + BN affine + ReLU, no HBM pad / im2col.

      x_ref   : (1, H, W, C)  bf16 unpadded image, resident across the H-tile axis
      w_ref   : (9, C, C)     bf16 per-tap block-diagonal (grouped) weights
      s/b     : (1, C)        f32  folded BN affine
      o_ref   : (1, tile_h, W, C) bf16 lane-dense output tile
      pad_ref : (tile_h+2, W+2, C) bf16 VMEM scratch — zero-padded slab built
                here each step (halo rows read from the resident image), so the
                1-pixel halo never round-trips through HBM.
    """
    c = w_ref.shape[2]
    h = pl.program_id(1)
    row0 = pl.multiple_of(h * tile_h, tile_h)

    # Build the zero-padded slab in VMEM.
    pad_ref[...] = jnp.zeros_like(pad_ref)
    pad_ref[pl.ds(1, tile_h), pl.ds(1, w_out), :] = \
        x_ref[0, pl.ds(row0, tile_h), :, :]

    @pl.when(h > 0)
    def _():  # top halo row from the previous H tile
        pad_ref[pl.ds(0, 1), pl.ds(1, w_out), :] = \
            x_ref[0, pl.ds(row0 - 1, 1), :, :]

    @pl.when(h < pl.num_programs(1) - 1)
    def _():  # bottom halo row from the next H tile
        pad_ref[pl.ds(tile_h + 1, 1), pl.ds(1, w_out), :] = \
            x_ref[0, pl.ds(row0 + tile_h, 1), :, :]

    # 9 shifted matmuls against block-diagonal per-tap weights.
    acc = jnp.zeros((tile_h * w_out, c), jnp.float32)
    for kh in range(3):
        for kw in range(3):
            tap = pad_ref[pl.ds(kh, tile_h), pl.ds(kw, w_out), :]
            tap = tap.reshape(tile_h * w_out, c)
            acc = acc + jnp.dot(tap, w_ref[kh * 3 + kw],
                                preferred_element_type=jnp.float32)
    y = jnp.maximum(acc * s_ref[...] + b_ref[...], 0.0)
    o_ref[0] = y.reshape(tile_h, w_out, c).astype(o_ref.dtype)


def _pick_tile_h(h_out, w_out, max_m=256):
    """Largest divisor of h_out with tile_h*w_out <= max_m (MXU fill vs. spill)."""
    best = 1
    for t in range(1, h_out + 1):
        if h_out % t == 0 and t * w_out <= max_m:
            best = t
    return best


def grouped_conv_bn_relu(h1, w_taps_bf16, scale, shift, *, cardinality):
    """h1: (N, H, W, C) bf16 unpadded activation (output of conv1)."""
    N, H, W, C = h1.shape
    tile_h = _pick_tile_h(H, W)
    n_h = H // tile_h
    cost = pl.CostEstimate(
        # True grouped-conv FLOPs: the zero blocks of the block-diagonal
        # weights are not useful work.
        flops=2 * 9 * N * H * W * C * (C // cardinality),
        transcendentals=0,
        bytes_accessed=N * H * W * C * 2 + 9 * C * C * 2 + N * H * W * C * 2)
    # TODO(synk): for very large images the whole-image VMEM residency should
    # become halo'd row-slab streaming (matters on v7x's 64 MiB VMEM).
    return pl.pallas_call(
        functools.partial(_gconv_bn_relu_kernel, tile_h=tile_h, w_out=W),
        grid=(N, n_h),
        in_specs=[
            # Full unpadded image; constant along the H-tile axis so it stays
            # VMEM-resident while the output tiles stream out.
            pl.BlockSpec((1, H, W, C), lambda n, h: (n, 0, 0, 0)),
            pl.BlockSpec((9, C, C), lambda n, h: (0, 0, 0)),   # resident weights
            pl.BlockSpec((1, C), lambda n, h: (0, 0)),
            pl.BlockSpec((1, C), lambda n, h: (0, 0)),
        ],
        out_specs=pl.BlockSpec((1, tile_h, W, C), lambda n, h: (n, h, 0, 0)),
        out_shape=jax.ShapeDtypeStruct((N, H, W, C), jnp.bfloat16),
        scratch_shapes=[pltpu.VMEM((tile_h + 2, W + 2, C), jnp.bfloat16)],
        compiler_params=pltpu.CompilerParams(
            # Each (n, h) step is self-contained -> both axes can be sharded
            # across the 2 TensorCores on v7x.
            dimension_semantics=("parallel", "parallel"),
            vmem_limit_bytes=_VMEM_LIMIT),
        cost_estimate=cost,
    )(h1, w_taps_bf16, scale.reshape(1, -1), shift.reshape(1, -1))


def _out_shortcut_kernel(h_ref, w3_ref, s3_ref, b3_ref,
                         xs_ref, ws_ref, ss_ref, bs_ref, o_ref):
    """conv3(1x1)+bn3, projection-shortcut conv(1x1)+bn, add, ReLU — fused."""
    main = jnp.dot(h_ref[...], w3_ref[...], preferred_element_type=jnp.float32)
    main = main * s3_ref[...] + b3_ref[...]
    sc = jnp.dot(xs_ref[...].astype(jnp.bfloat16), ws_ref[...],
                 preferred_element_type=jnp.float32)
    sc = sc * ss_ref[...] + bs_ref[...]
    o_ref[...] = jnp.maximum(main + sc, 0.0).astype(o_ref.dtype)


def _out_plain_kernel(h_ref, w3_ref, s3_ref, b3_ref, o_ref):
    """conv3(1x1)+bn3+ReLU (the reference adds NO identity when isShortcut=False)."""
    main = jnp.dot(h_ref[...], w3_ref[...], preferred_element_type=jnp.float32)
    main = main * s3_ref[...] + b3_ref[...]
    o_ref[...] = jnp.maximum(main, 0.0).astype(o_ref.dtype)


def conv3_bn_shortcut(h2, w3_bf16, s3, b3, xs, ws_bf16, ss, bs, *,
                      out_dtype=jnp.float32, tile_p=2048):
    P, gw = h2.shape
    cout = w3_bf16.shape[1]
    cin = xs.shape[1]
    tp = min(tile_p, P)
    ob = jnp.dtype(out_dtype).itemsize
    cost = pl.CostEstimate(
        flops=2 * P * cout * (gw + cin),
        transcendentals=0,
        bytes_accessed=P * gw * 2 + P * cin * xs.dtype.itemsize
        + (gw + cin) * cout * 2 + P * cout * ob)
    return pl.pallas_call(
        _out_shortcut_kernel,
        grid=(pl.cdiv(P, tp),),
        in_specs=[
            pl.BlockSpec((tp, gw), lambda i: (i, 0)),
            pl.BlockSpec((gw, cout), lambda i: (0, 0)),
            pl.BlockSpec((1, cout), lambda i: (0, 0)),
            pl.BlockSpec((1, cout), lambda i: (0, 0)),
            pl.BlockSpec((tp, cin), lambda i: (i, 0)),
            pl.BlockSpec((cin, cout), lambda i: (0, 0)),
            pl.BlockSpec((1, cout), lambda i: (0, 0)),
            pl.BlockSpec((1, cout), lambda i: (0, 0)),
        ],
        out_specs=pl.BlockSpec((tp, cout), lambda i: (i, 0)),
        out_shape=jax.ShapeDtypeStruct((P, cout), out_dtype),
        compiler_params=pltpu.CompilerParams(
            dimension_semantics=("parallel",),
            vmem_limit_bytes=_VMEM_LIMIT),
        cost_estimate=cost,
    )(h2, w3_bf16, s3.reshape(1, -1), b3.reshape(1, -1),
      xs, ws_bf16, ss.reshape(1, -1), bs.reshape(1, -1))


def conv3_bn_plain(h2, w3_bf16, s3, b3, *, out_dtype=jnp.float32, tile_p=2048):
    P, gw = h2.shape
    cout = w3_bf16.shape[1]
    tp = min(tile_p, P)
    ob = jnp.dtype(out_dtype).itemsize
    cost = pl.CostEstimate(
        flops=2 * P * gw * cout, transcendentals=0,
        bytes_accessed=P * gw * 2 + gw * cout * 2 + P * cout * ob)
    return pl.pallas_call(
        _out_plain_kernel,
        grid=(pl.cdiv(P, tp),),
        in_specs=[
            pl.BlockSpec((tp, gw), lambda i: (i, 0)),
            pl.BlockSpec((gw, cout), lambda i: (0, 0)),
            pl.BlockSpec((1, cout), lambda i: (0, 0)),
            pl.BlockSpec((1, cout), lambda i: (0, 0)),
        ],
        out_specs=pl.BlockSpec((tp, cout), lambda i: (i, 0)),
        out_shape=jax.ShapeDtypeStruct((P, cout), out_dtype),
        compiler_params=pltpu.CompilerParams(
            dimension_semantics=("parallel",),
            vmem_limit_bytes=_VMEM_LIMIT),
        cost_estimate=cost,
    )(h2, w3_bf16, s3.reshape(1, -1), b3.reshape(1, -1))


# ----------------------------------------------------------------------------
# Parameters / glue
# ----------------------------------------------------------------------------

def bn_affine(gamma, beta, mean, var, eps=1e-5):
    scale = gamma / jnp.sqrt(var + eps)
    shift = beta - mean * scale
    return scale, shift


def init_block_params(key, in_planes, cardinality, bottleneck_width, stride):
    gw = cardinality * bottleneck_width
    expansion = 2

    def bn_params(k, c):
        k1, k2, k3, k4 = jax.random.split(k, 4)
        gamma = 1.0 + 0.1 * jax.random.normal(k1, (c,), jnp.float32)
        beta = 0.1 * jax.random.normal(k2, (c,), jnp.float32)
        mean = 0.1 * jax.random.normal(k3, (c,), jnp.float32)
        var = 1.0 + 0.1 * jnp.abs(jax.random.normal(k4, (c,), jnp.float32))
        return gamma, beta, mean, var

    keys = jax.random.split(key, 8)
    params = {}
    # PyTorch OIHW conv-weight layouts.
    params['w1'] = 0.05 * jax.random.normal(keys[0], (gw, in_planes, 1, 1), jnp.float32)
    params['bn1'] = bn_params(keys[1], gw)
    params['w2'] = 0.05 * jax.random.normal(
        keys[2], (gw, gw // cardinality, 3, 3), jnp.float32)
    params['bn2'] = bn_params(keys[3], gw)
    params['w3'] = 0.05 * jax.random.normal(keys[4], (expansion * gw, gw, 1, 1), jnp.float32)
    params['bn3'] = bn_params(keys[5], expansion * gw)
    is_shortcut = (stride != 1) or (in_planes != expansion * gw)
    if is_shortcut:
        params['ws'] = 0.05 * jax.random.normal(
            keys[6], (expansion * gw, in_planes, 1, 1), jnp.float32)
        params['bns'] = bn_params(keys[7], expansion * gw)
    return params, is_shortcut


def prepare_block_params(params, is_shortcut, cardinality):
    """One-time weight/BN preparation hoisted off the forward hot path:
    folded BN affines, 1x1 weight transposes, and the per-tap block-diagonal
    grouped-conv weights."""
    gw = params['w1'].shape[0]
    bw_pg = gw // cardinality
    prep = {}
    prep['w1'] = params['w1'][:, :, 0, 0].T.astype(jnp.bfloat16)       # (Cin, gw)
    prep['s1'], prep['b1'] = bn_affine(*params['bn1'])

    w2 = params['w2'].reshape(cardinality, bw_pg, bw_pg, 3, 3)         # (G,o,i,kh,kw)
    w_taps = jnp.zeros((9, gw, gw), jnp.float32)
    for g in range(cardinality):
        wt = jnp.transpose(w2[g], (2, 3, 1, 0)).reshape(9, bw_pg, bw_pg)   # (9,i,o)
        w_taps = w_taps.at[:, g * bw_pg:(g + 1) * bw_pg,
                           g * bw_pg:(g + 1) * bw_pg].set(wt)
    prep['w_taps'] = w_taps.astype(jnp.bfloat16)
    prep['s2'], prep['b2'] = bn_affine(*params['bn2'])

    prep['w3'] = params['w3'][:, :, 0, 0].T.astype(jnp.bfloat16)       # (gw, 2*gw)
    prep['s3'], prep['b3'] = bn_affine(*params['bn3'])
    if is_shortcut:
        prep['ws'] = params['ws'][:, :, 0, 0].T.astype(jnp.bfloat16)   # (Cin, 2*gw)
        prep['ss'], prep['bs'] = bn_affine(*params['bns'])
    return prep


def block_forward(x_nhwc, prep, is_shortcut, cardinality, bottleneck_width,
                  stride, out_dtype=jnp.float32):
    N, H, W, cin = x_nhwc.shape
    gw = cardinality * bottleneck_width
    cout = 2 * gw

    # --- conv1 (1x1) + bn1 + relu : tiled matmul, bf16 writeback -------------
    h1 = matmul_bn(x_nhwc.reshape(N * H * W, cin), prep['w1'], prep['s1'],
                   prep['b1'], relu=True, out_dtype=jnp.bfloat16)
    h1 = h1.reshape(N, H, W, gw)

    # --- conv2 (3x3 grouped) + bn2 + relu : 9-tap shift+matmul kernel --------
    # No jnp.pad HBM round trip: the 1-pixel halo is built in VMEM inside the
    # kernel from the resident (bf16) image.
    h2_full = grouped_conv_bn_relu(h1, prep['w_taps'], prep['s2'], prep['b2'],
                                   cardinality=cardinality)
    # TODO(synk): for stride > 1 the kernel computes the stride-1 conv and the
    # result is subsampled here (stride^2 redundant MXU work); the blocks of
    # interest here use stride=1.
    if stride > 1:
        h2_full = h2_full[:, ::stride, ::stride, :]
    _, Ho, Wo, _ = h2_full.shape
    P = N * Ho * Wo
    h2 = h2_full.reshape(P, gw)                                # bf16, lane-dense

    # --- conv3 (1x1) + bn3 (+ projection shortcut) + relu : fused kernel -----
    # out_dtype defaults to f32 at the module boundary; pass bf16 when the
    # next block consumes bf16 activations.
    if is_shortcut:
        xs = x_nhwc[:, ::stride, ::stride, :].reshape(P, cin)
        out = conv3_bn_shortcut(h2, prep['w3'], prep['s3'], prep['b3'],
                                xs, prep['ws'], prep['ss'], prep['bs'],
                                out_dtype=out_dtype)
    else:
        out = conv3_bn_plain(h2, prep['w3'], prep['s3'], prep['b3'],
                             out_dtype=out_dtype)
    return out.reshape(N, Ho, Wo, cout)


# ----------------------------------------------------------------------------
# Pure-JAX reference (for correctness check)
# ----------------------------------------------------------------------------

def block_reference(x_nhwc, params, is_shortcut, cardinality, bottleneck_width, stride):
    x = jnp.transpose(x_nhwc, (0, 3, 1, 2))                    # NCHW

    def conv(inp, w, strd=1, groups=1):
        pad = [(1, 1), (1, 1)] if w.shape[-1] == 3 else [(0, 0), (0, 0)]
        return lax.conv_general_dilated(
            inp, w, (strd, strd), pad, feature_group_count=groups,
            dimension_numbers=('NCHW', 'OIHW', 'NCHW'),
            precision=lax.Precision.HIGHEST)

    def bn(inp, p):
        s, b = bn_affine(*p)
        return inp * s[None, :, None, None] + b[None, :, None, None]

    h = jax.nn.relu(bn(conv(x, params['w1']), params['bn1']))
    h = jax.nn.relu(bn(conv(h, params['w2'], strd=stride, groups=cardinality),
                       params['bn2']))
    h = bn(conv(h, params['w3']), params['bn3'])
    if is_shortcut:
        h = h + bn(conv(x, params['ws'], strd=stride), params['bns'])
    return jnp.transpose(jax.nn.relu(h), (0, 2, 3, 1))


# ----------------------------------------------------------------------------

if __name__ == "__main__":
    key = jax.random.PRNGKey(0)
    k_x, k_p = jax.random.split(key)

    # Small but consistent with the module: group_width = 4*32 = 128,
    # expansion*group_width = 256 != in_planes  -> projection shortcut active.
    in_planes, cardinality, bottleneck_width, stride = 64, 4, 32, 1
    N, H, W = 2, 8, 8

    x_nchw = jax.random.normal(k_x, (N, in_planes, H, W), jnp.float32)  # PyTorch layout
    x_nhwc = jnp.transpose(x_nchw, (0, 2, 3, 1))

    params, is_shortcut = init_block_params(
        k_p, in_planes, cardinality, bottleneck_width, stride)
    prep = prepare_block_params(params, is_shortcut, cardinality)

    out = block_forward(x_nhwc, prep, is_shortcut,
                        cardinality, bottleneck_width, stride)
    out = jax.block_until_ready(out)

    ref = block_reference(x_nhwc, params, is_shortcut,
                          cardinality, bottleneck_width, stride)
    assert out.shape == (N, H, W, 2 * cardinality * bottleneck_width), out.shape
    # bf16 MXU operands and bf16 intermediate activations -> bf16-class error
    # vs. the f32 (HIGHEST) reference.
    assert jnp.allclose(out, ref, atol=7.5e-2, rtol=7.5e-2), \
        float(jnp.max(jnp.abs(out - ref)))

    print("KERNEL_OK")
</pallas_src>

<mosaic_0001>
module attributes {stable_mosaic.version = 11 : i64} {
  func.func @_mm_bn_kernel(%arg0: i32, %arg1: memref<128x64xf32, #tpu.memory_space<vmem>>, %arg2: memref<64x128xbf16, #tpu.memory_space<vmem>>, %arg3: memref<1x128xf32, #tpu.memory_space<vmem>>, %arg4: memref<1x128xf32, #tpu.memory_space<vmem>>, %arg5: memref<128x128xbf16, #tpu.memory_space<vmem>>) attributes {dimension_semantics = [#tpu.dimension_semantics<parallel>], iteration_bounds = array<i64: 1>, scalar_prefetch = 0 : i64, scratch_operands = 0 : i64, tpu.core_type = #tpu.core_type<tc>, window_params = [{transform_indices = @transform_0, window_bounds = array<i64: 128, 64>}, {pipeline_mode = #tpu.pipeline_mode<synchronous>, transform_indices = @transform_1, window_bounds = array<i64: 64, 128>}, {pipeline_mode = #tpu.pipeline_mode<synchronous>, transform_indices = @transform_2, window_bounds = array<i64: 1, 128>}, {pipeline_mode = #tpu.pipeline_mode<synchronous>, transform_indices = @transform_3, window_bounds = array<i64: 1, 128>}, {transform_indices = @transform_4, window_bounds = array<i64: 128, 128>}]} {
    %c0 = arith.constant 0 : index
    %c0_0 = arith.constant 0 : index
    %0 = vector.load %arg1[%c0, %c0_0] : memref<128x64xf32, #tpu.memory_space<vmem>>, vector<128x64xf32>
    %1 = arith.truncf %0 : vector<128x64xf32> to vector<128x64xbf16>
    %c0_1 = arith.constant 0 : index
    %c0_2 = arith.constant 0 : index
    %2 = vector.load %arg2[%c0_1, %c0_2] : memref<64x128xbf16, #tpu.memory_space<vmem>>, vector<64x128xbf16>
    %cst = arith.constant dense<0.000000e+00> : vector<128x128xf32>
    %3 = tpu.matmul %1, %2, %cst {dimension_numbers = #tpu.dot_dimension_numbers<[1], [0], [0], [1], [0, 0, 1, 1], [], []>} : vector<128x64xbf16>, vector<64x128xbf16>, vector<128x128xf32> -> vector<128x128xf32>
    %c0_3 = arith.constant 0 : index
    %c0_4 = arith.constant 0 : index
    %4 = vector.load %arg3[%c0_3, %c0_4] : memref<1x128xf32, #tpu.memory_space<vmem>>, vector<1x128xf32>
    %5 = vector.broadcast %4 : vector<1x128xf32> to vector<128x128xf32>
    %6 = arith.mulf %3, %5 : vector<128x128xf32>
    %c0_5 = arith.constant 0 : index
    %c0_6 = arith.constant 0 : index
    %7 = vector.load %arg4[%c0_5, %c0_6] : memref<1x128xf32, #tpu.memory_space<vmem>>, vector<1x128xf32>
    %8 = vector.broadcast %7 : vector<1x128xf32> to vector<128x128xf32>
    %9 = arith.addf %6, %8 : vector<128x128xf32>
    %cst_7 = arith.constant 0.000000e+00 : f32
    %10 = vector.broadcast %cst_7 : f32 to vector<128x128xf32>
    %11 = arith.maximumf %9, %10 : vector<128x128xf32>
    %12 = arith.truncf %11 : vector<128x128xf32> to vector<128x128xbf16>
    %c0_8 = arith.constant 0 : index
    %c0_9 = arith.constant 0 : index
    %13 = vector.load %arg5[%c0_8, %c0_9] : memref<128x128xbf16, #tpu.memory_space<vmem>>, vector<128x128xbf16>
    tpu.vector_store %arg5[%c0_8, %c0_9], %12 {strides = array<i32>} : memref<128x128xbf16, #tpu.memory_space<vmem>>, vector<128x128xbf16>,
    return
  }
  func.func @transform_0(%arg0: i32) -> (i32, i32) {
    %c0_i32 = arith.constant 0 : i32
    %c0_i32_0 = arith.constant 0 : i32
    return %arg0, %c0_i32 : i32, i32
  }
  func.func @transform_1(%arg0: i32) -> (i32, i32) {
    %c0_i32 = arith.constant 0 : i32
    %c0_i32_0 = arith.constant 0 : i32
    %c0_i32_1 = arith.constant 0 : i32
    return %c0_i32, %c0_i32_0 : i32, i32
  }
  func.func @transform_2(%arg0: i32) -> (i32, i32) {
    %c0_i32 = arith.constant 0 : i32
    %c0_i32_0 = arith.constant 0 : i32
    %c0_i32_1 = arith.constant 0 : i32
    return %c0_i32, %c0_i32_0 : i32, i32
  }
  func.func @transform_3(%arg0: i32) -> (i32, i32) {
    %c0_i32 = arith.constant 0 : i32
    %c0_i32_0 = arith.constant 0 : i32
    %c0_i32_1 = arith.constant 0 : i32
    return %c0_i32, %c0_i32_0 : i32, i32
  }
  func.func @transform_4(%arg0: i32) -> (i32, i32) {
    %c0_i32 = arith.constant 0 : i32
    %c0_i32_0 = arith.constant 0 : i32
    return %arg0, %c0_i32 : i32, i32
  }
}

</mosaic_0001>

<bundles_post_ra>
// kernel: tpu_custom_call.1
= control target key start
LH: loop header
LB: loop body
LE: loop exit
PB: predicated region body
PF: predicated region fallthrough
CT: control target
= control target key end

     0   :  { %vm75_vm0 = vcmask 523264   ;;  %s626_s0 = inlined_call_operand.vmem [shape: f32[128,64], index: 0, kind: input, shape index: {}]   ;;  %s627_s1 = inlined_call_operand.vmem [shape: bf16[64,128], index: 1, kind: input, shape index: {}]   ;;  %s628_s2 = inlined_call_operand.vmem [shape: f32[1,128], index: 2, kind: input, shape index: {}]   ;;  %s629_s3 = inlined_call_operand.vmem [shape: f32[1,128], index: 3, kind: input, shape index: {}]   ;;  %s630_s4 = inlined_call_operand.hbm [shape: bf16[128,128], index: 4, kind: output, shape index: {}]  }
   0x1   :  { %v495_v0 = vld [vmem:[%s627_s1 + $0x18] sm:$0xff]   ;;  %v496_v1 = vld [vmem:[%s627_s1 + $0x10] sm:$0xff]   ;;  %v497_v2 = vld [vmem:[%s627_s1 + $0x8] sm:$0xff]  }
   0x2   :  { %460 = vmatprep.subr.bf16.mxu0 %v495_v0  ;;  %484 = vmatprep.subr.bf16.mxu1 %v495_v0  ;;  %v19_v3 = vld [vmem:[%s626_s0] sm:$0xff]  ;;  %v20_v4 = vld [vmem:[%s626_s0 + $0x8] sm:$0xff] }
   0x3   :  { %461 = vmatpush3.bf16.msra.mxu0 %v495_v0  ;;  %488 = vmatpush3.bf16.msra.mxu1 %v495_v0  ;;  %v27_v5 = vld [vmem:[%s626_s0 + $0x40] sm:$0xff]  ;;  %v35_v6 = vpack.c.bf16 %v20_v4, %v19_v3  ;;  %v28_v7 = vld [vmem:[%s626_s0 + $0x48] sm:$0xff] }
   0x4   :  { %462 = vmatprep.subr.bf16.mxu0 %v496_v1  ;;  %485 = vmatprep.subr.bf16.mxu1 %v496_v1  ;;  %v39_v8 = vpack.c.bf16 %v28_v7, %v27_v5  ;;  %v498_v9 = vld [vmem:[%s627_s1] sm:$0xff]  }
   0x5   :  { %468 = vmatprep.mubr.msk.bf16.mxu0 %vm75_vm0, %v35_v6 }
   0x6   :  { %476 = vmatprep.mubr.msk.bf16.mxu1 %vm75_vm0, %v39_v8 }
   0x7   :  { %463 = vmatpush3.bf16.msra.mxu0 %v496_v1  ;;  %489 = vmatpush3.bf16.msra.mxu1 %v496_v1 }
   0x8   :  { %464 = vmatprep.subr.bf16.mxu0 %v497_v2  ;;  %486 = vmatprep.subr.bf16.mxu1 %v497_v2 }
   0x9   :  { %9 = vsyncpa [#allocation3], 0  ;;  %v21_v10 = vld [vmem:[%s626_s0 + $0x10] sm:$0xff]  ;;  %v22_v11 = vld [vmem:[%s626_s0 + $0x18] sm:$0xff] }
   0xa   :  { %v29_v12 = vld [vmem:[%s626_s0 + $0x50] sm:$0xff]  ;;  %v30_v13 = vld [vmem:[%s626_s0 + $0x58] sm:$0xff]  ;;  %v23_v14 = vld [vmem:[%s626_s0 + $0x20] sm:$0xff]  ;;  %v36_v18 = vpack.c.bf16 %v22_v11, %v21_v10 }
   0xb   :  { %465 = vmatpush3.bf16.msra.mxu0 %v497_v2  ;;  %490 = vmatpush3.bf16.msra.mxu1 %v497_v2  ;;  %v24_v15 = vld [vmem:[%s626_s0 + $0x28] sm:$0xff]  ;;  %v31_v16 = vld [vmem:[%s626_s0 + $0x60] sm:$0xff]  ;;  %v40_v19 = vpack.c.bf16 %v30_v13, %v29_v12  ;;  %v25_v22 = vld [vmem:[%s626_s0 + $0x30] sm:$0xff] }
   0xc   :  { %466 = vmatprep.subr.bf16.mxu0 %v498_v9  ;;  %487 = vmatprep.subr.bf16.mxu1 %v498_v9  ;;  %v32_v17 = vld [vmem:[%s626_s0 + $0x68] sm:$0xff]  ;;  %v37_v20 = vpack.c.bf16 %v24_v15, %v23_v14  ;;  %v26_v23 = vld [vmem:[%s626_s0 + $0x38] sm:$0xff]  ;;  %v33_v24 = vld [vmem:[%s626_s0 + $0x70] sm:$0xff] }
   0xd   :  { %v41_v21 = vpack.c.bf16 %v32_v17, %v31_v16  ;;  %v34_v25 = vld [vmem:[%s626_s0 + $0x78] sm:$0xff]  ;;  %v38_v26 = vpack.c.bf16 %v26_v23, %v25_v22  ;;  %v367_v28 = vld [vmem:[%s628_s2] ss:$0 sm:$0xff]  ;;  %s521_s0 = smov [#allocation2]  }
   0xe   :  { %v42_v27 = vpack.c.bf16 %v34_v25, %v33_v24  ;;  %v368_v33 = vld [vmem:[%s629_s3] ss:$0 sm:$0xff]  ;;  %s344_s2 = sshll.u32 %s521_s0, 4  ;;  %s345_s2 = int_to_ptr.vmem [resolvable:$true] %s344_s2 }
   0xf   :  { %467 = vmatpush3.bf16.msra.mxu0 %v498_v9  ;;  %491 = vmatpush3.bf16.msra.mxu1 %v498_v9  ;;  %s499_s3 = scalar_lea.vmem %s345_s2, 1024  ;;  %p504_p1 = scmp.lt.s32.totalorder %s345_s2, %s345_s2 }
  0x10   :  { %p500_p0 = scmp.ne.s32.totalorder %s345_s2, %s499_s3  ;;  %p505_p2 = scmp.lt.s32.totalorder %s499_s3, %s499_s3 }
  0x12   :  { %469 = vmatmul.mubr.msk.bf16.vlgmr.msra.gmra.mxu0 %vm75_vm0, %v36_v18  ;;  %477 = vmatmul.mubr.msk.bf16.vlgmr.msra.gmra.mxu1 %vm75_vm0, %v40_v19  ;;  %p506_p3 = por %p505_p2, %p504_p1 }
  0x13   :  { %472 = vmatprep.mubr.msk.bf16.mxu0 %vm75_vm0, %v37_v20  ;;  %480 = vmatprep.mubr.msk.bf16.mxu1 %vm75_vm0, %v41_v21 }
  0x14   :  { %p507_p4 = pnand %p506_p3, %p500_p0 }
  0x1a   :  { %473 = vmatmul.mubr.msk.bf16.gmra.mxu0 %vm75_vm0, %v38_v26  ;;  %481 = vmatmul.mubr.msk.bf16.gmra.mxu1 %vm75_vm0, %v42_v27 }
  0xd2   :  { %v470_v29 = vpop.f32.mrf.mxu0  ;;  %v478_v30 = vpop.f32.mrf.mxu1 }
  0xd3   :  { %v206_v31 = vmul.f32 %v470_v29, %v367_v28  ;;  %v214_v32 = vmul.f32 %v478_v30, %v367_v28 }
  0xd4   :  { %v134_v34 = vpop.f32.mrf.mxu0  ;;  %v166_v35 = vpop.f32.mrf.mxu1 }
  0xd5   :  { %v204_v36 = vmul.f32 %v367_v28, %v134_v34  ;;  %v212_v37 = vmul.f32 %v367_v28, %v166_v35  ;;  %v229_v40 = vadd.f32 %v368_v33, %v206_v31  ;;  %v237_v41 = vadd.f32 %v368_v33, %v214_v32 }
  0xd6   :  { %v471_v38 = vpop.f32.mrf.mxu0  ;;  %v479_v39 = vpop.f32.mrf.mxu1 }
  0xd7   :  { %v207_v42 = vmul.f32 %v471_v38, %v367_v28  ;;  %v215_v43 = vmul.f32 %v479_v39, %v367_v28  ;;  %v227_v46 = vadd.f32 %v368_v33, %v204_v36  ;;  %v235_v47 = vadd.f32 %v368_v33, %v212_v37 }
  0xd8   :  { %v137_v44 = vpop.f32.mrf.mxu0  ;;  %v169_v45 = vpop.f32.mrf.mxu1  ;;  %v245_v54 = vmax.f32 %v229_v40, 0.0  ;;  %v253_v55 = vmax.f32 %v237_v41, 0.0 }
  0xd9   :  { %v205_v48 = vmul.f32 %v367_v28, %v137_v44  ;;  %v213_v49 = vmul.f32 %v367_v28, %v169_v45  ;;  %v230_v50 = vadd.f32 %v368_v33, %v207_v42  ;;  %v238_v51 = vadd.f32 %v368_v33, %v215_v43 }
  0xda   :  { %v474_v52 = vpop.f32.mrf.mxu0  ;;  %v482_v53 = vpop.f32.mrf.mxu1  ;;  %v243_v0 = vmax.f32 %v227_v46, 0.0  ;;  %v251_v1 = vmax.f32 %v235_v47, 0.0 }
  0xdb   :  { %v228_v56 = vadd.f32 %v368_v33, %v205_v48  ;;  %v236_v57 = vadd.f32 %v368_v33, %v213_v49  ;;  %v246_v58 = vmax.f32 %v230_v50, 0.0  ;;  %v254_v59 = vmax.f32 %v238_v51, 0.0 }
  0xdc   :  { %v210_v60 = vmul.f32 %v474_v52, %v367_v28  ;;  %v218_v61 = vmul.f32 %v482_v53, %v367_v28  ;;  %v150_v62 = vpop.f32.mrf.mxu0  ;;  %v182_v63 = vpop.f32.mrf.mxu1 }
  0xdd   :  { %v244_v2 = vmax.f32 %v228_v56, 0.0  ;;  %v252_v3 = vmax.f32 %v236_v57, 0.0  ;;  %v409_v4 = vpack.c.bf16 %v246_v58, %v245_v54  ;;  %v429_v5 = vpack.c.bf16 %v254_v59, %v253_v55 }
  0xde   :  { %v208_v6 = vmul.f32 %v367_v28, %v150_v62  ;;  %v216_v7 = vmul.f32 %v367_v28, %v182_v63  ;;  %v475_v8 = vpop.f32.mrf.mxu0  ;;  %v483_v9 = vpop.f32.mrf.mxu1  ;;  %v233_v12 = vadd.f32 %v368_v33, %v210_v60  ;;  %v241_v13 = vadd.f32 %v368_v33, %v218_v61 }
  0xdf   :  { %v404_v10 = vpack.c.bf16 %v244_v2, %v243_v0  ;;  %v424_v11 = vpack.c.bf16 %v252_v3, %v251_v1  ;;  %441 = vst [vmem:[#allocation2 + $0x8] sm:$0xff] %v409_v4   ;;  %445 = vst [vmem:[#allocation2 + $0x28] sm:$0xff] %v429_v5   ;;  %v211_v14 = vmul.f32 %v475_v8, %v367_v28 }
  0xe0   :  { %v219_v15 = vmul.f32 %v483_v9, %v367_v28  ;;  %v153_v16 = vpop.f32.mrf.mxu0  ;;  %v185_v17 = vpop.f32.mrf.mxu1  ;;  %v231_v18 = vadd.f32 %v368_v33, %v208_v6  ;;  %v239_v19 = vadd.f32 %v368_v33, %v216_v7  ;;  %v249_v26 = vmax.f32 %v233_v12, 0.0 }
  0xe1   :  { %405 = vst [vmem:[#allocation2] sm:$0xff] %v404_v10   ;;  %444 = vst [vmem:[#allocation2 + $0x20] sm:$0xff] %v424_v11   ;;  %v209_v20 = vmul.f32 %v367_v28, %v153_v16  ;;  %v217_v21 = vmul.f32 %v367_v28, %v185_v17  ;;  %v234_v22 = vadd.f32 %v368_v33, %v211_v14  ;;  %v257_v27 = vmax.f32 %v241_v13, 0.0 }
  0xe2   :  { %v242_v23 = vadd.f32 %v368_v33, %v219_v15  ;;  %v247_v31 = vmax.f32 %v231_v18, 0.0  ;;  %v255_v32 = vmax.f32 %v239_v19, 0.0 }
  0xe3   :  { %v232_v24 = vadd.f32 %v368_v33, %v209_v20  ;;  %v240_v25 = vadd.f32 %v368_v33, %v217_v21  ;;  %v250_v29 = vmax.f32 %v234_v22, 0.0 }
  0xe4   :  { %v258_v30 = vmax.f32 %v242_v23, 0.0 }
  0xe5   :  { %v248_v34 = vmax.f32 %v232_v24, 0.0  ;;  %v256_v35 = vmax.f32 %v240_v25, 0.0  ;;  %v419_v36 = vpack.c.bf16 %v250_v29, %v249_v26 }
  0xe6   :  { %v439_v37 = vpack.c.bf16 %v258_v30, %v257_v27 }
  0xe7   :  { %v414_v38 = vpack.c.bf16 %v248_v34, %v247_v31  ;;  %v434_v39 = vpack.c.bf16 %v256_v35, %v255_v32  ;;  %443 = vst [vmem:[#allocation2 + $0x18] sm:$0xff] %v419_v36  }
  0xe8   :  { %447 = vst [vmem:[#allocation2 + $0x38] sm:$0xff] %v439_v37  }
  0xe9   :  { %442 = vst [vmem:[#allocation2 + $0x10] sm:$0xff] %v414_v38   ;;  %446 = vst [vmem:[#allocation2 + $0x30] sm:$0xff] %v434_v39  }
  0xea   :  { %510 = shalt.err (!%p507_p4)
}
  0xeb   :  { %s522_s6 = smov 64   ;;  %s523_s7 = smov 4  }
  0xec   :  { %350 = dma.vmem_to_hbm [thread:$0]  %s345_s2, 1024, %s630_s4, [#allocation3], %s522_s6, %s522_s6, %s523_s7  }
  0xed   :  { %519 = dma.done.wait [#allocation3], 1024  }
  0xee   :  { %520 = vsyncadd [#allocation3], 4294966272 }
  0xef   :  { %354 = vsyncpa [#allocation3], 1 }

</bundles_post_ra>
